<compile_context>
chip_gen: v6e
topology: v6e:2x2x1
jax: 0.10.0
libtpu: 0.0.40
codegen_flags: <defaults>
</compile_context>

<pallas_src>
import functools

import jax
import jax.numpy as jnp
from jax.experimental import pallas as pl
from jax.experimental.pallas import tpu as pltpu


# --------------------------------------------------------------------------- #
# Kernel
# --------------------------------------------------------------------------- #
def _static_film_kernel(x_ref, scale_ref, shift_ref, o_ref, *, compute_dtype):
    # x_ref:     (TM, TN) tile of the (possibly lane-packed) [Mp, Cp] input
    # scale_ref: (1, TN)  broadcast over rows
    # shift_ref: (1, TN)
    x = x_ref[...].astype(compute_dtype)
    scale = scale_ref[...].astype(compute_dtype)
    shift = shift_ref[...].astype(compute_dtype)
    o_ref[...] = (x * (scale + 1.0) + shift).astype(o_ref.dtype)


# --------------------------------------------------------------------------- #
# Chip detection & per-generation tuning
# --------------------------------------------------------------------------- #
def _chip_kind() -> str:
    try:
        kind = jax.devices()[0].device_kind.lower()
    except Exception:  # pragma: no cover - defensive
        kind = ""
    if "v5 lite" in kind or "v5e" in kind or "v5litepod" in kind:
        return "v5e"
    if "v7" in kind:
        return "v7x"
    if "v6" in kind:
        return "v6e"
    return "other"


def _perf_params(kind: str):
    if kind == "v7x":
        # 64 MiB physical VMEM / TC: 4 buffers x 8 MiB = 32 MiB; leave headroom.
        return dict(target_block_bytes=8 << 20, min_steps=8,
                    vmem_limit_bytes=40 << 20, core_parallel=True,
                    bf16_native=True)
    if kind == "v5e":
        # Default scoped VMEM is only 16 MiB; 4 x 4 MiB buffers need a raise.
        return dict(target_block_bytes=4 << 20, min_steps=3,
                    vmem_limit_bytes=32 << 20, core_parallel=False,
                    bf16_native=False)
    # v6e and unknown chips: 4 x 4 MiB fits the 32 MiB default scoped limit.
    return dict(target_block_bytes=4 << 20, min_steps=3,
                vmem_limit_bytes=None, core_parallel=False,
                bf16_native=True)


# --------------------------------------------------------------------------- #
# Tiling helpers
# --------------------------------------------------------------------------- #
def _sublane_min(itemsize: int) -> int:
    # f32 -> 8, bf16 -> 16, int8/fp8 -> 32
    return 8 * max(1, 4 // itemsize)


def _round_up(x: int, m: int) -> int:
    return -(-x // m) * m


def _choose_tiles(Mp: int, Cp: int, itemsize: int, sublane: int,
                  target_block_bytes: int, min_steps: int):
    """Pick (tm, tn): ~target_block_bytes per block, sublane/lane aligned,
    keep >= min_steps row blocks when the problem is large enough, and split
    the channel dim only when a minimal (sublane, Cp) slab is already huge."""
    # Column tile (rarely needed; protects VMEM for very large C).
    if Cp > 128 and sublane * Cp * itemsize > target_block_bytes:
        tn = (target_block_bytes // (sublane * itemsize) // 128) * 128
        tn = max(128, min(tn, _round_up(Cp, 128)))
    else:
        tn = Cp

    # Row tile.
    if Mp <= sublane:
        tm = Mp  # block equals full dim -> always a legal block shape
    else:
        rows = target_block_bytes // max(1, tn * itemsize)
        rows = max(sublane, (rows // sublane) * sublane)
        if Mp >= min_steps * sublane:
            cap = max(sublane, _round_up(pl.cdiv(Mp, min_steps), sublane))
            rows = min(rows, cap)
        rows = min(rows, _round_up(Mp, sublane))
        tm = rows
    return tm, tn


# --------------------------------------------------------------------------- #
# Forward wrapper
# --------------------------------------------------------------------------- #
def static_film_forward(in_tensor, scale, shift, time_tensor=None):
    """FiLM forward: in_tensor * (scale + 1) + shift.

    in_tensor: [B, N, C]
    scale, shift: [1, C] (the registered parameters of StaticFilm)
    time_tensor: unused (kept for signature parity with the PyTorch forward)
    """
    del time_tensor  # unused by StaticFilm.forward

    B, N, C = in_tensor.shape
    M = B * N
    dtype = in_tensor.dtype
    itemsize = jnp.dtype(dtype).itemsize
    sublane = _sublane_min(itemsize)

    kind = _chip_kind()
    params = _perf_params(kind)

    # bf16-native compute on chips with bf16 VALUs; f32 otherwise.
    if dtype == jnp.bfloat16 and params["bf16_native"]:
        compute_dtype = jnp.bfloat16
    else:
        compute_dtype = jnp.float32

    # --- Lane-dense packing: fold k rows into lanes when C is lane-sparse. ---
    # Pad M up to a multiple of k instead of dropping the packing.
    k = 1
    if C < 128 and 128 % C == 0:
        k = 128 // C
    # TODO(synk): generalize lane packing for C values that don't divide 128
    # (flatten to [M*C/128, 128] with a periodic scale/shift tile).
    M_pad = _round_up(M, k)

    x_flat = in_tensor.reshape(M, C)
    if M_pad != M:
        x_flat = jnp.pad(x_flat, ((0, M_pad - M), (0, 0)))
    Mp, Cp = M_pad // k, C * k
    x2d = x_flat.reshape(Mp, Cp)

    scale2d = jnp.tile(scale.reshape(1, C).astype(compute_dtype), (1, k))
    shift2d = jnp.tile(shift.reshape(1, C).astype(compute_dtype), (1, k))

    # --- Tile selection + ragged grid. ---
    tm, tn = _choose_tiles(Mp, Cp, itemsize, sublane,
                           params["target_block_bytes"], params["min_steps"])
    grid = (pl.cdiv(Mp, tm), pl.cdiv(Cp, tn))

    cost = pl.CostEstimate(
        flops=2 * M * C,
        transcendentals=0,
        bytes_accessed=2 * M * C * itemsize + 2 * C * 4,
    )

    def _run(dim_semantics):
        return pl.pallas_call(
            functools.partial(_static_film_kernel, compute_dtype=compute_dtype),
            out_shape=jax.ShapeDtypeStruct((Mp, Cp), dtype),
            grid_spec=pltpu.PrefetchScalarGridSpec(
                num_scalar_prefetch=0,
                grid=grid,
                in_specs=[
                    pl.BlockSpec((tm, tn), lambda i, j: (i, j)),
                    pl.BlockSpec((1, tn), lambda i, j: (0, j)),
                    pl.BlockSpec((1, tn), lambda i, j: (0, j)),
                ],
                out_specs=pl.BlockSpec((tm, tn), lambda i, j: (i, j)),
            ),
            compiler_params=pltpu.CompilerParams(
                dimension_semantics=dim_semantics,
                vmem_limit_bytes=params["vmem_limit_bytes"],
            ),
            cost_estimate=cost,
        )(x2d, scale2d, shift2d)

    use_core_parallel = params["core_parallel"] and grid[0] >= 2
    if use_core_parallel:
        try:
            # Shard the row axis across v7x's two TensorCores.
            out2d = _run((pltpu.CORE_PARALLEL, pltpu.PARALLEL))
        except Exception:
            out2d = _run(("parallel", "parallel"))
    else:
        out2d = _run(("parallel", "parallel"))

    out = out2d.reshape(M_pad, C)
    if M_pad != M:
        out = out[:M]
    return out.reshape(B, N, C)


# --------------------------------------------------------------------------- #
# Parameter construction (emulates StaticFilm.__init__, plain JAX setup glue)
# --------------------------------------------------------------------------- #
def build_static_film_params(key, emb_dim, channels):
    """scale, shift = Linear(emb_dim, 2*channels)(time_embedding).chunk(2, -1),
    then scale[None, ...], shift[None, ...]."""
    k_w, k_b, k_t = jax.random.split(key, 3)
    w = jax.random.normal(k_w, (emb_dim, 2 * channels), jnp.float32) * 0.02
    b = jax.random.normal(k_b, (2 * channels,), jnp.float32) * 0.02
    time_embedding = jax.random.normal(k_t, (emb_dim,), jnp.float32)
    affine = time_embedding @ w + b           # (2*channels,)
    scale, shift = jnp.split(affine, 2, axis=-1)
    return scale[None, :], shift[None, :]     # [1, C] each


if __name__ == "__main__":
    key = jax.random.PRNGKey(0)
    k_params, k_x, k_t = jax.random.split(key, 3)

    B, N, C = 2, 8, 32
    emb_dim = 16

    scale, shift = build_static_film_params(k_params, emb_dim, C)
    in_tensor = jax.random.normal(k_x, (B, N, C), jnp.float32)
    time_tensor = jax.random.normal(k_t, (B, emb_dim), jnp.float32)  # unused

    out = static_film_forward(in_tensor, scale, shift, time_tensor)
    out = jax.block_until_ready(out)

    ref = in_tensor * (scale + 1.0) + shift
    assert out.shape == (B, N, C)
    assert jnp.allclose(out, ref, atol=1e-6), "mismatch vs reference"

    # Ragged M (111 rows) with lane packing -> exercises M-padding + cdiv grid.
    B2, N2, C2 = 3, 37, 64
    x2 = jax.random.normal(jax.random.PRNGKey(1), (B2, N2, C2), jnp.float32)
    s2, h2 = build_static_film_params(jax.random.PRNGKey(2), emb_dim, C2)
    out2 = jax.block_until_ready(static_film_forward(x2, s2, h2))
    ref2 = x2 * (s2 + 1.0) + h2
    assert jnp.allclose(out2, ref2, atol=1e-6), "mismatch vs reference (ragged)"

    # bf16 path (native bf16 compute on v6e/v7x, f32 on v5e) -> looser tolerance.
    B3, N3, C3 = 2, 64, 128
    x3 = jax.random.normal(jax.random.PRNGKey(3), (B3, N3, C3), jnp.float32)
    s3, h3 = build_static_film_params(jax.random.PRNGKey(4), emb_dim, C3)
    out3 = jax.block_until_ready(
        static_film_forward(x3.astype(jnp.bfloat16), s3, h3))
    ref3 = (x3 * (s3 + 1.0) + h3)
    assert jnp.allclose(out3.astype(jnp.float32), ref3, atol=5e-2, rtol=5e-2), \
        "mismatch vs reference (bf16)"

    print("KERNEL_OK")
</pallas_src>

<mosaic_0001>
module attributes {stable_mosaic.version = 11 : i64} {
  func.func @_static_film_kernel(%arg0: i32, %arg1: i32, %arg2: memref<4x128xf32, #tpu.memory_space<vmem>>, %arg3: memref<1x128xf32, #tpu.memory_space<vmem>>, %arg4: memref<1x128xf32, #tpu.memory_space<vmem>>, %arg5: memref<4x128xf32, #tpu.memory_space<vmem>>) attributes {dimension_semantics = [#tpu.dimension_semantics<parallel>, #tpu.dimension_semantics<parallel>], iteration_bounds = array<i64: 1, 1>, scalar_prefetch = 0 : i64, scratch_operands = 0 : i64, tpu.core_type = #tpu.core_type<tc>, window_params = [{transform_indices = @transform_0, window_bounds = array<i64: 4, 128>}, {transform_indices = @transform_1, window_bounds = array<i64: 1, 128>}, {transform_indices = @transform_2, window_bounds = array<i64: 1, 128>}, {transform_indices = @transform_3, window_bounds = array<i64: 4, 128>}]} {
    %c0 = arith.constant 0 : index
    %c0_0 = arith.constant 0 : index
    %0 = vector.load %arg2[%c0, %c0_0] : memref<4x128xf32, #tpu.memory_space<vmem>>, vector<4x128xf32>
    %c0_1 = arith.constant 0 : index
    %c0_2 = arith.constant 0 : index
    %1 = vector.load %arg3[%c0_1, %c0_2] : memref<1x128xf32, #tpu.memory_space<vmem>>, vector<1x128xf32>
    %c0_3 = arith.constant 0 : index
    %c0_4 = arith.constant 0 : index
    %2 = vector.load %arg4[%c0_3, %c0_4] : memref<1x128xf32, #tpu.memory_space<vmem>>, vector<1x128xf32>
    %cst = arith.constant 1.000000e+00 : f32
    %3 = vector.broadcast %cst : f32 to vector<1x128xf32>
    %4 = arith.addf %1, %3 : vector<1x128xf32>
    %5 = vector.broadcast %4 : vector<1x128xf32> to vector<4x128xf32>
    %6 = arith.mulf %0, %5 : vector<4x128xf32>
    %7 = vector.broadcast %2 : vector<1x128xf32> to vector<4x128xf32>
    %8 = arith.addf %6, %7 : vector<4x128xf32>
    %c0_5 = arith.constant 0 : index
    %c0_6 = arith.constant 0 : index
    %9 = vector.load %arg5[%c0_5, %c0_6] : memref<4x128xf32, #tpu.memory_space<vmem>>, vector<4x128xf32>
    tpu.vector_store %arg5[%c0_5, %c0_6], %8 {strides = array<i32>} : memref<4x128xf32, #tpu.memory_space<vmem>>, vector<4x128xf32>,
    return
  }
  func.func @transform_0(%arg0: i32, %arg1: i32) -> (i32, i32) {
    %c0_i32 = arith.constant 0 : i32
    return %arg0, %arg1 : i32, i32
  }
  func.func @transform_1(%arg0: i32, %arg1: i32) -> (i32, i32) {
    %c0_i32 = arith.constant 0 : i32
    %c0_i32_0 = arith.constant 0 : i32
    return %c0_i32, %arg1 : i32, i32
  }
  func.func @transform_2(%arg0: i32, %arg1: i32) -> (i32, i32) {
    %c0_i32 = arith.constant 0 : i32
    %c0_i32_0 = arith.constant 0 : i32
    return %c0_i32, %arg1 : i32, i32
  }
  func.func @transform_3(%arg0: i32, %arg1: i32) -> (i32, i32) {
    %c0_i32 = arith.constant 0 : i32
    return %arg0, %arg1 : i32, i32
  }
}

</mosaic_0001>

<bundles_post_ra>
// kernel: tpu_custom_call.1
= control target key start
LH: loop header
LB: loop body
LE: loop exit
PB: predicated region body
PF: predicated region fallthrough
CT: control target
= control target key end

     0   :  { %8 = vsyncpa [#allocation3], 0  ;;  %s142_s0 = inlined_call_operand.hbm [shape: f32[4,128], index: 0, kind: input, shape index: {}]   ;;  %s143_s1 = inlined_call_operand.vmem [shape: f32[1,128], index: 1, kind: input, shape index: {}]   ;;  %s144_s2 = inlined_call_operand.vmem [shape: f32[1,128], index: 2, kind: input, shape index: {}]   ;;  %s145_s3 = inlined_call_operand.hbm [shape: f32[4,128], index: 3, kind: output, shape index: {}]  }
   0x1   :  { %9 = vsyncpa [#allocation4], 0  ;;  %s108_s12 = smov [#allocation2]  }
   0x2   :  { %s16_s13 = sshll.u32 %s108_s12, 4  ;;  %s17_s13 = int_to_ptr.vmem [resolvable:$true] %s16_s13 }
   0x3   :  { %s72_s14 = scalar_lea.vmem %s17_s13, 64  ;;  %p77_p1 = scmp.lt.s32.totalorder %s17_s13, %s17_s13 }
   0x4   :  { %p73_p0 = scmp.ne.s32.totalorder %s17_s13, %s72_s14  ;;  %p78_p2 = scmp.lt.s32.totalorder %s72_s14, %s72_s14 }
   0x6   :  { %p79_p3 = por %p78_p2, %p77_p1 }
   0x8   :  { %p80_p4 = pnand %p79_p3, %p73_p0 }
   0xa   :  { %83 = shalt.err (!%p80_p4)
}
   0xb   :  { %19 = dma.hbm_to_vmem [thread:$0]  %s142_s0, 64, %s17_s13, [#allocation3]  }
   0xc   :  { %104 = dma.done.wait [#allocation3], 64  }
   0xd   :  { %105 = vsyncadd [#allocation3], 4294967232  ;;  %v32_v0 = vlaneseq  ;;  %v28_v3 = vld [vmem:[%s143_s1] sm:$0x1]  ;;  %s109_s21 = smov [#allocation5]  }
   0xe   :  { %v30_v4 = vadd.f32 1.0, %v28_v3  ;;  %v27_v5 = vld [vmem:[#allocation2] sm:$0xf]  ;;  %s52_s22 = sshll.u32 %s109_s21, 4  ;;  %s53_s22 = int_to_ptr.vmem [resolvable:$true] %s52_s22 }
   0xf   :  { %v33_v1 = vshrl.u32 %v32_v0, 7  ;;  %v61_v7 = vld [vmem:[%s144_s2] ss:$0 sm:$0xff]  ;;  %s84_s0 = scalar_lea.vmem %s53_s22, 64  ;;  %p89_p6 = scmp.lt.s32.totalorder %s53_s22, %s53_s22 }
  0x10   :  { %p85_p5 = scmp.ne.s32.totalorder %s53_s22, %s84_s0  ;;  %p90_p7 = scmp.lt.s32.totalorder %s84_s0, %s84_s0 }
  0x11   :  { %v34_v2 = vsub.s32 0, %v33_v1 }
  0x12   :  { %p91_p8 = por %p90_p7, %p89_p6 }
  0x13   :  { %v35_v6 = vrot.slane %v30_v4, %v34_v2 }
  0x14   :  { %p92_p9 = pnand %p91_p8, %p85_p5 }
  0x15   :  { %v37_v8 = vmul.f32 %v35_v6, %v27_v5 }
  0x17   :  { %v44_v9 = vadd.f32 %v61_v7, %v37_v8 }
  0x19   :  { %45 = vst [vmem:[#allocation5] sm:$0xf] %v44_v9 }
  0x1a   :  { %95 = shalt.err (!%p92_p9)
}
  0x1b   :  { %55 = dma.vmem_to_hbm [thread:$0]  %s53_s22, 64, %s145_s3, [#allocation4]  }
  0x1c   :  { %106 = dma.done.wait [#allocation4], 64  }
  0x1d   :  { %107 = vsyncadd [#allocation4], 4294967232 }
  0x1e   :  { %59 = vsyncpa [#allocation3], 1 }
  0x1f   :  { %60 = vsyncpa [#allocation4], 1 }

</bundles_post_ra>
